<compile_context>
chip_gen: v7x
topology: tpu7x:2x2x1
jax: 0.10.0
libtpu: 0.0.40
codegen_flags: <defaults>
</compile_context>

<pallas_src>
import functools
import math

import jax
import jax.numpy as jnp
import numpy as np
from jax.experimental import pallas as pl
from jax.experimental.pallas import tpu as pltpu


def _mhca_kernel(x_ref, y_ref, mask_ref, wkv_ref, bkv_ref, wq_ref, bq_ref,
                 wout_ref, bout_ref, out_ref, *, num_heads, head_dim,
                 approx_recip):
    bblk, S, D = x_ref.shape
    H, hd = num_heads, head_dim
    n = bblk * S
    cdt = wkv_ref.dtype  # compute dtype for MXU operands (bf16 or f32)

    # ---- fused projections on the flattened (block_b*S, D) row slab ----
    x2 = x_ref[...].reshape(n, D).astype(cdt)
    y2 = y_ref[...].reshape(n, D).astype(cdt)

    kv = jnp.dot(x2, wkv_ref[...], preferred_element_type=jnp.float32) + bkv_ref[...]
    q = jnp.dot(y2, wq_ref[...], preferred_element_type=jnp.float32) + bq_ref[...]
    # (1/sqrt(head_dim) is already folded into wq/bq by the wrapper)

    k_all = kv[:, :D]   # columns pre-permuted to [K(all heads) | V(all heads)]
    v_all = kv[:, D:]

    def to_heads(t):  # (n, H*hd) head-major columns -> (H*bblk, S, hd)
        th = jnp.stack([t[:, h * hd:(h + 1) * hd] for h in range(H)], axis=0)
        return th.reshape(H * bblk, S, hd)

    qh = to_heads(q).astype(cdt)
    kh = to_heads(k_all).astype(cdt)
    vh = to_heads(v_all).astype(cdt)

    # ---- attention scores, batched over the fused (head, batch) axis ----
    scores = jnp.einsum('bqd,bkd->bqk', qh, kh,
                        preferred_element_type=jnp.float32)        # (H*bblk, S, S)
    # additive mask, broadcast over heads (fused batch index = h*bblk + b)
    scores = scores + jnp.tile(mask_ref[...], (H, 1, 1))

    # ---- numerically stable softmax in f32, reciprocal on the EUP ----
    m = jnp.max(scores, axis=-1, keepdims=True)
    e = jnp.exp(scores - m)
    denom = jnp.sum(e, axis=-1, keepdims=True)
    attn = (e * pl.reciprocal(denom, approx=approx_recip)).astype(cdt)

    # ---- attention-weighted values, batched over (head, batch) ----
    vals = jnp.einsum('bqk,bkd->bqd', attn, vh,
                      preferred_element_type=jnp.float32)          # (H*bblk, S, hd)

    # merge heads back onto the lane axis -> (n, D) head-major columns
    vals = vals.reshape(H, n, hd)
    values = jnp.concatenate([vals[h] for h in range(H)], axis=-1).astype(cdt)

    # ---- output projection ----
    out = jnp.dot(values, wout_ref[...], preferred_element_type=jnp.float32)
    out = out + bout_ref[...]
    out_ref[...] = out.reshape(bblk, S, D).astype(out_ref.dtype)


def _pick_block_b(batch, seq):
    # aim for ~128 rows per grid step in the projection M dimension
    target = min(batch, max(1, 128 // max(seq, 1)))
    for cand in range(target, 0, -1):
        if batch % cand == 0:
            return cand
    return 1


def multi_head_cross_attention(x, y, mask, w_kv, b_kv, w_q, b_q, w_out, b_out,
                               *, num_heads, compute_dtype=jnp.bfloat16,
                               block_b=None):
    """Pallas forward of MultiHeadCrossAttention.

    x, y : (B, S, D)   kv-source / q-source
    mask : (B, S, S)   additive logits mask, broadcast over heads
    Weights are in PyTorch nn.Linear layout: w (out_features, in_features), b (out,).
    """
    B, S, D = x.shape
    assert y.shape == (B, S, D) and mask.shape == (B, S, S)
    assert D % num_heads == 0
    hd = D // num_heads
    assert S % 8 == 0, "sequence length must be a multiple of 8 (sublane tiling)"

    if block_b is None:
        block_b = _pick_block_b(B, S)
    assert B % block_b == 0

    # ---- wrapper-side weight prep (cheap XLA ops, outside the kernel) ----
    scale = 1.0 / math.sqrt(hd)

    # permute kv columns: PyTorch head-interleaved [k_h | v_h] -> [K(all) | V(all)]
    c = np.arange(2 * D)
    is_v = c >= D
    cc = np.where(is_v, c - D, c)
    perm = (cc // hd) * 2 * hd + np.where(is_v, hd, 0) + cc % hd

    wkv = jnp.asarray(w_kv).T[:, perm].astype(compute_dtype)             # (D, 2D)
    bkv = jnp.asarray(b_kv)[perm].reshape(1, 2 * D).astype(jnp.float32)
    wq = (jnp.asarray(w_q).T * scale).astype(compute_dtype)              # (D, D)
    bq = (jnp.asarray(b_q) * scale).reshape(1, D).astype(jnp.float32)
    wout = jnp.asarray(w_out).T.astype(compute_dtype)                    # (D, D)
    bout = jnp.asarray(b_out).reshape(1, D).astype(jnp.float32)
    mask_f32 = mask.astype(jnp.float32)

    kernel = functools.partial(
        _mhca_kernel, num_heads=num_heads, head_dim=hd,
        approx_recip=(compute_dtype != jnp.float32))

    return pl.pallas_call(
        kernel,
        out_shape=jax.ShapeDtypeStruct((B, S, D), x.dtype),
        grid_spec=pltpu.PrefetchScalarGridSpec(
            num_scalar_prefetch=0,
            grid=(B // block_b,),
            in_specs=[
                pl.BlockSpec((block_b, S, D), lambda b: (b, 0, 0)),    # x (kv source)
                pl.BlockSpec((block_b, S, D), lambda b: (b, 0, 0)),    # y (q source)
                pl.BlockSpec((block_b, S, S), lambda b: (b, 0, 0)),    # mask
                pl.BlockSpec((D, 2 * D), lambda b: (0, 0)),            # Wkv (permuted)
                pl.BlockSpec((1, 2 * D), lambda b: (0, 0)),            # bkv
                pl.BlockSpec((D, D), lambda b: (0, 0)),                # Wq (pre-scaled)
                pl.BlockSpec((1, D), lambda b: (0, 0)),                # bq (pre-scaled)
                pl.BlockSpec((D, D), lambda b: (0, 0)),                # Wout
                pl.BlockSpec((1, D), lambda b: (0, 0)),                # bout
            ],
            out_specs=pl.BlockSpec((block_b, S, D), lambda b: (b, 0, 0)),
        ),
        compiler_params=pltpu.CompilerParams(
            dimension_semantics=("parallel",),
            vmem_limit_bytes=32 * 1024 * 1024,
        ),
    )(x, y, mask_f32, wkv, bkv, wq, bq, wout, bout)


def reference_mhca(x, y, mask, w_kv, b_kv, w_q, b_q, w_out, b_out, *, num_heads):
    """Pure-JAX reference mirroring the PyTorch module exactly."""
    B, S, D = x.shape
    hd = D // num_heads
    kv = x @ w_kv.T + b_kv                                       # (B, S, 2D)
    q = y @ w_q.T + b_q                                          # (B, S, D)
    kv = kv.reshape(B, S, num_heads, 2 * hd).transpose(0, 2, 1, 3)
    q = q.reshape(B, S, num_heads, hd).transpose(0, 2, 1, 3)
    k, v = jnp.split(kv, 2, axis=-1)
    scaled = jnp.einsum('bhqd,bhkd->bhqk', q, k) / math.sqrt(hd)
    # scaled.permute(1,0,2,3) + mask(B,S,S), permuted back == scaled + mask[:,None]
    scaled = scaled + mask[:, None, :, :]
    attn = jax.nn.softmax(scaled, axis=-1)
    vals = jnp.einsum('bhqk,bhkd->bhqd', attn, v)
    vals = vals.transpose(0, 2, 1, 3).reshape(B, S, D)
    return vals @ w_out.T + b_out


if __name__ == "__main__":
    B, S, D, H = 2, 8, 32, 4

    key = jax.random.PRNGKey(0)
    kx, ky, km, k1, k2, k3, k4, k5, k6 = jax.random.split(key, 9)

    x = jax.random.normal(kx, (B, S, D), dtype=jnp.float32)
    y = jax.random.normal(ky, (B, S, D), dtype=jnp.float32)
    mask = jnp.where(jax.random.uniform(km, (B, S, S)) < 0.2, -1e9, 0.0).astype(jnp.float32)

    # PyTorch nn.Linear layout weights (out_features, in_features)
    w_kv = jax.random.normal(k1, (2 * D, D), dtype=jnp.float32) / math.sqrt(D)
    b_kv = jax.random.normal(k2, (2 * D,), dtype=jnp.float32) * 0.01
    w_q = jax.random.normal(k3, (D, D), dtype=jnp.float32) / math.sqrt(D)
    b_q = jax.random.normal(k4, (D,), dtype=jnp.float32) * 0.01
    w_out = jax.random.normal(k5, (D, D), dtype=jnp.float32) / math.sqrt(D)
    b_out = jax.random.normal(k6, (D,), dtype=jnp.float32) * 0.01

    ref = reference_mhca(x, y, mask, w_kv, b_kv, w_q, b_q, w_out, b_out, num_heads=H)

    # f32 path: verifies module semantics tightly.
    out_f32 = multi_head_cross_attention(
        x, y, mask, w_kv, b_kv, w_q, b_q, w_out, b_out,
        num_heads=H, compute_dtype=jnp.float32)
    out_f32 = jax.block_until_ready(out_f32)
    assert out_f32.shape == (B, S, D)
    assert jnp.allclose(out_f32, ref, rtol=1e-3, atol=1e-3), "f32 kernel mismatch vs reference"

    # bf16-MXU-operand fast path (f32 accumulation / softmax): looser sanity bound.
    out_bf16 = multi_head_cross_attention(
        x, y, mask, w_kv, b_kv, w_q, b_q, w_out, b_out,
        num_heads=H, compute_dtype=jnp.bfloat16)
    out_bf16 = jax.block_until_ready(out_bf16)
    assert jnp.allclose(out_bf16, ref, rtol=1e-1, atol=1e-1), "bf16 kernel mismatch vs reference"

    print("KERNEL_OK")
</pallas_src>

<mosaic_0001>
module attributes {stable_mosaic.version = 11 : i64} {
  func.func @_mhca_kernel(%arg0: i32, %arg1: memref<2x8x32xf32, #tpu.memory_space<vmem>>, %arg2: memref<2x8x32xf32, #tpu.memory_space<vmem>>, %arg3: memref<2x8x8xf32, #tpu.memory_space<vmem>>, %arg4: memref<32x64xf32, #tpu.memory_space<vmem>>, %arg5: memref<1x64xf32, #tpu.memory_space<vmem>>, %arg6: memref<32x32xf32, #tpu.memory_space<vmem>>, %arg7: memref<1x32xf32, #tpu.memory_space<vmem>>, %arg8: memref<32x32xf32, #tpu.memory_space<vmem>>, %arg9: memref<1x32xf32, #tpu.memory_space<vmem>>, %arg10: memref<2x8x32xf32, #tpu.memory_space<vmem>>) attributes {dimension_semantics = [#tpu.dimension_semantics<parallel>], iteration_bounds = array<i64: 1>, scalar_prefetch = 0 : i64, scratch_operands = 0 : i64, tpu.core_type = #tpu.core_type<tc>, window_params = [{transform_indices = @transform_0, window_bounds = array<i64: 2, 8, 32>}, {transform_indices = @transform_1, window_bounds = array<i64: 2, 8, 32>}, {transform_indices = @transform_2, window_bounds = array<i64: 2, 8, 8>}, {pipeline_mode = #tpu.pipeline_mode<synchronous>, transform_indices = @transform_3, window_bounds = array<i64: 32, 64>}, {pipeline_mode = #tpu.pipeline_mode<synchronous>, transform_indices = @transform_4, window_bounds = array<i64: 1, 64>}, {pipeline_mode = #tpu.pipeline_mode<synchronous>, transform_indices = @transform_5, window_bounds = array<i64: 32, 32>}, {pipeline_mode = #tpu.pipeline_mode<synchronous>, transform_indices = @transform_6, window_bounds = array<i64: 1, 32>}, {pipeline_mode = #tpu.pipeline_mode<synchronous>, transform_indices = @transform_7, window_bounds = array<i64: 32, 32>}, {pipeline_mode = #tpu.pipeline_mode<synchronous>, transform_indices = @transform_8, window_bounds = array<i64: 1, 32>}, {transform_indices = @transform_9, window_bounds = array<i64: 2, 8, 32>}]} {
    %c0 = arith.constant 0 : index
    %c0_0 = arith.constant 0 : index
    %c0_1 = arith.constant 0 : index
    %0 = vector.load %arg1[%c0, %c0_0, %c0_1] : memref<2x8x32xf32, #tpu.memory_space<vmem>>, vector<2x8x32xf32>
    %1 = vector.shape_cast %0 : vector<2x8x32xf32> to vector<16x32xf32>
    %c0_2 = arith.constant 0 : index
    %c0_3 = arith.constant 0 : index
    %c0_4 = arith.constant 0 : index
    %2 = vector.load %arg2[%c0_2, %c0_3, %c0_4] : memref<2x8x32xf32, #tpu.memory_space<vmem>>, vector<2x8x32xf32>
    %3 = vector.shape_cast %2 : vector<2x8x32xf32> to vector<16x32xf32>
    %c0_5 = arith.constant 0 : index
    %c0_6 = arith.constant 0 : index
    %4 = vector.load %arg4[%c0_5, %c0_6] : memref<32x64xf32, #tpu.memory_space<vmem>>, vector<32x64xf32>
    %cst = arith.constant dense<0.000000e+00> : vector<16x64xf32>
    %5 = tpu.matmul %1, %4, %cst {dimension_numbers = #tpu.dot_dimension_numbers<[1], [0], [0], [1], [0, 0, 1, 1], [], []>} : vector<16x32xf32>, vector<32x64xf32>, vector<16x64xf32> -> vector<16x64xf32>
    %c0_7 = arith.constant 0 : index
    %c0_8 = arith.constant 0 : index
    %6 = vector.load %arg5[%c0_7, %c0_8] : memref<1x64xf32, #tpu.memory_space<vmem>>, vector<1x64xf32>
    %7 = vector.broadcast %6 : vector<1x64xf32> to vector<16x64xf32>
    %8 = arith.addf %5, %7 : vector<16x64xf32>
    %c0_9 = arith.constant 0 : index
    %c0_10 = arith.constant 0 : index
    %9 = vector.load %arg6[%c0_9, %c0_10] : memref<32x32xf32, #tpu.memory_space<vmem>>, vector<32x32xf32>
    %cst_11 = arith.constant dense<0.000000e+00> : vector<16x32xf32>
    %10 = tpu.matmul %3, %9, %cst_11 {dimension_numbers = #tpu.dot_dimension_numbers<[1], [0], [0], [1], [0, 0, 1, 1], [], []>} : vector<16x32xf32>, vector<32x32xf32>, vector<16x32xf32> -> vector<16x32xf32>
    %c0_12 = arith.constant 0 : index
    %c0_13 = arith.constant 0 : index
    %11 = vector.load %arg7[%c0_12, %c0_13] : memref<1x32xf32, #tpu.memory_space<vmem>>, vector<1x32xf32>
    %12 = vector.broadcast %11 : vector<1x32xf32> to vector<16x32xf32>
    %13 = arith.addf %10, %12 : vector<16x32xf32>
    %14 = vector.extract_strided_slice %8 {offsets = [0, 0], sizes = [16, 32], strides = [1, 1]} : vector<16x64xf32> to vector<16x32xf32>
    %15 = vector.extract_strided_slice %8 {offsets = [0, 32], sizes = [16, 32], strides = [1, 1]} : vector<16x64xf32> to vector<16x32xf32>
    %16 = vector.extract_strided_slice %13 {offsets = [0, 0], sizes = [16, 8], strides = [1, 1]} : vector<16x32xf32> to vector<16x8xf32>
    %17 = vector.extract_strided_slice %13 {offsets = [0, 8], sizes = [16, 8], strides = [1, 1]} : vector<16x32xf32> to vector<16x8xf32>
    %18 = vector.extract_strided_slice %13 {offsets = [0, 16], sizes = [16, 8], strides = [1, 1]} : vector<16x32xf32> to vector<16x8xf32>
    %19 = vector.extract_strided_slice %13 {offsets = [0, 24], sizes = [16, 8], strides = [1, 1]} : vector<16x32xf32> to vector<16x8xf32>
    %20 = vector.shape_cast %16 : vector<16x8xf32> to vector<1x16x8xf32>
    %21 = vector.shape_cast %17 : vector<16x8xf32> to vector<1x16x8xf32>
    %22 = vector.shape_cast %18 : vector<16x8xf32> to vector<1x16x8xf32>
    %23 = vector.shape_cast %19 : vector<16x8xf32> to vector<1x16x8xf32>
    %24 = tpu.concatenate %20, %21, %22, %23 in 0 : vector<1x16x8xf32>, vector<1x16x8xf32>, vector<1x16x8xf32>, vector<1x16x8xf32> -> vector<4x16x8xf32>
    %25 = vector.shape_cast %24 : vector<4x16x8xf32> to vector<8x8x8xf32>
    %26 = vector.extract_strided_slice %14 {offsets = [0, 0], sizes = [16, 8], strides = [1, 1]} : vector<16x32xf32> to vector<16x8xf32>
    %27 = vector.extract_strided_slice %14 {offsets = [0, 8], sizes = [16, 8], strides = [1, 1]} : vector<16x32xf32> to vector<16x8xf32>
    %28 = vector.extract_strided_slice %14 {offsets = [0, 16], sizes = [16, 8], strides = [1, 1]} : vector<16x32xf32> to vector<16x8xf32>
    %29 = vector.extract_strided_slice %14 {offsets = [0, 24], sizes = [16, 8], strides = [1, 1]} : vector<16x32xf32> to vector<16x8xf32>
    %30 = vector.shape_cast %26 : vector<16x8xf32> to vector<1x16x8xf32>
    %31 = vector.shape_cast %27 : vector<16x8xf32> to vector<1x16x8xf32>
    %32 = vector.shape_cast %28 : vector<16x8xf32> to vector<1x16x8xf32>
    %33 = vector.shape_cast %29 : vector<16x8xf32> to vector<1x16x8xf32>
    %34 = tpu.concatenate %30, %31, %32, %33 in 0 : vector<1x16x8xf32>, vector<1x16x8xf32>, vector<1x16x8xf32>, vector<1x16x8xf32> -> vector<4x16x8xf32>
    %35 = vector.shape_cast %34 : vector<4x16x8xf32> to vector<8x8x8xf32>
    %36 = vector.extract_strided_slice %15 {offsets = [0, 0], sizes = [16, 8], strides = [1, 1]} : vector<16x32xf32> to vector<16x8xf32>
    %37 = vector.extract_strided_slice %15 {offsets = [0, 8], sizes = [16, 8], strides = [1, 1]} : vector<16x32xf32> to vector<16x8xf32>
    %38 = vector.extract_strided_slice %15 {offsets = [0, 16], sizes = [16, 8], strides = [1, 1]} : vector<16x32xf32> to vector<16x8xf32>
    %39 = vector.extract_strided_slice %15 {offsets = [0, 24], sizes = [16, 8], strides = [1, 1]} : vector<16x32xf32> to vector<16x8xf32>
    %40 = vector.shape_cast %36 : vector<16x8xf32> to vector<1x16x8xf32>
    %41 = vector.shape_cast %37 : vector<16x8xf32> to vector<1x16x8xf32>
    %42 = vector.shape_cast %38 : vector<16x8xf32> to vector<1x16x8xf32>
    %43 = vector.shape_cast %39 : vector<16x8xf32> to vector<1x16x8xf32>
    %44 = tpu.concatenate %40, %41, %42, %43 in 0 : vector<1x16x8xf32>, vector<1x16x8xf32>, vector<1x16x8xf32>, vector<1x16x8xf32> -> vector<4x16x8xf32>
    %45 = vector.shape_cast %44 : vector<4x16x8xf32> to vector<8x8x8xf32>
    "tpu.trace_start"() <{level = 10 : i32, message = "bqd,bkd->bqk"}> : () -> ()
    %cst_14 = arith.constant dense<0.000000e+00> : vector<8x8x8xf32>
    %46 = tpu.matmul %25, %35, %cst_14 {dimension_numbers = #tpu.dot_dimension_numbers<[2], [2], [1], [1], [0, 0, 0, 1, 1, 1], [0], [0]>} : vector<8x8x8xf32>, vector<8x8x8xf32>, vector<8x8x8xf32> -> vector<8x8x8xf32>
    "tpu.trace_stop"() : () -> ()
    %c0_15 = arith.constant 0 : index
    %c0_16 = arith.constant 0 : index
    %c0_17 = arith.constant 0 : index
    %47 = vector.load %arg3[%c0_15, %c0_16, %c0_17] : memref<2x8x8xf32, #tpu.memory_space<vmem>>, vector<2x8x8xf32>
    %48 = tpu.concatenate %47, %47, %47, %47 in 0 : vector<2x8x8xf32>, vector<2x8x8xf32>, vector<2x8x8xf32>, vector<2x8x8xf32> -> vector<8x8x8xf32>
    %49 = arith.addf %46, %48 : vector<8x8x8xf32>
    %cst_18 = arith.constant dense<0xFF800000> : vector<8x8xf32>
    %50 = vector.multi_reduction <maximumf>, %49, %cst_18 [2] : vector<8x8x8xf32> to vector<8x8xf32>
    %51 = vector.shape_cast %50 : vector<8x8xf32> to vector<8x8x1xf32>
    %52 = vector.broadcast %51 : vector<8x8x1xf32> to vector<8x8x8xf32>
    %53 = arith.subf %49, %52 : vector<8x8x8xf32>
    %54 = math.exp %53 : vector<8x8x8xf32>
    %cst_19 = arith.constant dense<0.000000e+00> : vector<8x8xf32>
    %55 = vector.multi_reduction <add>, %54, %cst_19 [2] : vector<8x8x8xf32> to vector<8x8xf32>
    %56 = vector.shape_cast %55 : vector<8x8xf32> to vector<8x8x1xf32>
    %57 = tpu.reciprocal %56 : vector<8x8x1xf32> -> vector<8x8x1xf32>
    %58 = vector.broadcast %57 : vector<8x8x1xf32> to vector<8x8x8xf32>
    %59 = arith.mulf %54, %58 : vector<8x8x8xf32>
    "tpu.trace_start"() <{level = 10 : i32, message = "bqk,bkd->bqd"}> : () -> ()
    %cst_20 = arith.constant dense<0.000000e+00> : vector<8x8x8xf32>
    %60 = tpu.matmul %59, %45, %cst_20 {dimension_numbers = #tpu.dot_dimension_numbers<[2], [1], [1], [2], [0, 0, 0, 1, 1, 2], [0], [0]>} : vector<8x8x8xf32>, vector<8x8x8xf32>, vector<8x8x8xf32> -> vector<8x8x8xf32>
    "tpu.trace_stop"() : () -> ()
    %61 = vector.shape_cast %60 : vector<8x8x8xf32> to vector<4x16x8xf32>
    %62 = vector.extract_strided_slice %61 {offsets = [0, 0, 0], sizes = [1, 16, 8], strides = [1, 1, 1]} : vector<4x16x8xf32> to vector<1x16x8xf32>
    %63 = vector.shape_cast %62 : vector<1x16x8xf32> to vector<16x8xf32>
    %64 = vector.extract_strided_slice %61 {offsets = [1, 0, 0], sizes = [1, 16, 8], strides = [1, 1, 1]} : vector<4x16x8xf32> to vector<1x16x8xf32>
    %65 = vector.shape_cast %64 : vector<1x16x8xf32> to vector<16x8xf32>
    %66 = vector.extract_strided_slice %61 {offsets = [2, 0, 0], sizes = [1, 16, 8], strides = [1, 1, 1]} : vector<4x16x8xf32> to vector<1x16x8xf32>
    %67 = vector.shape_cast %66 : vector<1x16x8xf32> to vector<16x8xf32>
    %68 = vector.extract_strided_slice %61 {offsets = [3, 0, 0], sizes = [1, 16, 8], strides = [1, 1, 1]} : vector<4x16x8xf32> to vector<1x16x8xf32>
    %69 = vector.shape_cast %68 : vector<1x16x8xf32> to vector<16x8xf32>
    %70 = tpu.concatenate %63, %65, %67, %69 in 1 : vector<16x8xf32>, vector<16x8xf32>, vector<16x8xf32>, vector<16x8xf32> -> vector<16x32xf32>
    %c0_21 = arith.constant 0 : index
    %c0_22 = arith.constant 0 : index
    %71 = vector.load %arg8[%c0_21, %c0_22] : memref<32x32xf32, #tpu.memory_space<vmem>>, vector<32x32xf32>
    %cst_23 = arith.constant dense<0.000000e+00> : vector<16x32xf32>
    %72 = tpu.matmul %70, %71, %cst_23 {dimension_numbers = #tpu.dot_dimension_numbers<[1], [0], [0], [1], [0, 0, 1, 1], [], []>} : vector<16x32xf32>, vector<32x32xf32>, vector<16x32xf32> -> vector<16x32xf32>
    %c0_24 = arith.constant 0 : index
    %c0_25 = arith.constant 0 : index
    %73 = vector.load %arg9[%c0_24, %c0_25] : memref<1x32xf32, #tpu.memory_space<vmem>>, vector<1x32xf32>
    %74 = vector.broadcast %73 : vector<1x32xf32> to vector<16x32xf32>
    %75 = arith.addf %72, %74 : vector<16x32xf32>
    %76 = vector.shape_cast %75 : vector<16x32xf32> to vector<2x8x32xf32>
    %c0_26 = arith.constant 0 : index
    %c0_27 = arith.constant 0 : index
    %c0_28 = arith.constant 0 : index
    %77 = vector.load %arg10[%c0_26, %c0_27, %c0_28] : memref<2x8x32xf32, #tpu.memory_space<vmem>>, vector<2x8x32xf32>
    tpu.vector_store %arg10[%c0_26, %c0_27, %c0_28], %76 {strides = array<i32>} : memref<2x8x32xf32, #tpu.memory_space<vmem>>, vector<2x8x32xf32>,
    return
  }
  func.func @transform_0(%arg0: i32) -> (i32, i32, i32) {
    %c0_i32 = arith.constant 0 : i32
    %c0_i32_0 = arith.constant 0 : i32
    %c0_i32_1 = arith.constant 0 : i32
    return %arg0, %c0_i32, %c0_i32_0 : i32, i32, i32
  }
  func.func @transform_1(%arg0: i32) -> (i32, i32, i32) {
    %c0_i32 = arith.constant 0 : i32
    %c0_i32_0 = arith.constant 0 : i32
    %c0_i32_1 = arith.constant 0 : i32
    return %arg0, %c0_i32, %c0_i32_0 : i32, i32, i32
  }
  func.func @transform_2(%arg0: i32) -> (i32, i32, i32) {
    %c0_i32 = arith.constant 0 : i32
    %c0_i32_0 = arith.constant 0 : i32
    %c0_i32_1 = arith.constant 0 : i32
    return %arg0, %c0_i32, %c0_i32_0 : i32, i32, i32
  }
  func.func @transform_3(%arg0: i32) -> (i32, i32) {
    %c0_i32 = arith.constant 0 : i32
    %c0_i32_0 = arith.constant 0 : i32
    %c0_i32_1 = arith.constant 0 : i32
    return %c0_i32, %c0_i32_0 : i32, i32
  }
  func.func @transform_4(%arg0: i32) -> (i32, i32) {
    %c0_i32 = arith.constant 0 : i32
    %c0_i32_0 = arith.constant 0 : i32
    %c0_i32_1 = arith.constant 0 : i32
    return %c0_i32, %c0_i32_0 : i32, i32
  }
  func.func @transform_5(%arg0: i32) -> (i32, i32) {
    %c0_i32 = arith.constant 0 : i32
    %c0_i32_0 = arith.constant 0 : i32
    %c0_i32_1 = arith.constant 0 : i32
    return %c0_i32, %c0_i32_0 : i32, i32
  }
  func.func @transform_6(%arg0: i32) -> (i32, i32) {
    %c0_i32 = arith.constant 0 : i32
    %c0_i32_0 = arith.constant 0 : i32
    %c0_i32_1 = arith.constant 0 : i32
    return %c0_i32, %c0_i32_0 : i32, i32
  }
  func.func @transform_7(%arg0: i32) -> (i32, i32) {
    %c0_i32 = arith.constant 0 : i32
    %c0_i32_0 = arith.constant 0 : i32
    %c0_i32_1 = arith.constant 0 : i32
    return %c0_i32, %c0_i32_0 : i32, i32
  }
  func.func @transform_8(%arg0: i32) -> (i32, i32) {
    %c0_i32 = arith.constant 0 : i32
    %c0_i32_0 = arith.constant 0 : i32
    %c0_i32_1 = arith.constant 0 : i32
    return %c0_i32, %c0_i32_0 : i32, i32
  }
  func.func @transform_9(%arg0: i32) -> (i32, i32, i32) {
    %c0_i32 = arith.constant 0 : i32
    %c0_i32_0 = arith.constant 0 : i32
    %c0_i32_1 = arith.constant 0 : i32
    return %arg0, %c0_i32, %c0_i32_0 : i32, i32, i32
  }
}

</mosaic_0001>

<bundles_post_ra>
// kernel: tpu_custom_call.1
= control target key start
LH: loop header
LB: loop body
LE: loop exit
PB: predicated region body
PF: predicated region fallthrough
CT: control target
= control target key end

     0   :  { %14 = vsyncpa [#allocation3], 0  ;;  %s2562_s0 = inlined_call_operand.hbm [shape: f32[2,8,32], index: 0, kind: input, shape index: {}]   ;;  %s2563_s1 = inlined_call_operand.hbm [shape: f32[2,8,32], index: 1, kind: input, shape index: {}]   ;;  %s2564_s2 = inlined_call_operand.hbm [shape: f32[2,8,8], index: 2, kind: input, shape index: {}]   ;;  %s2565_s3 = inlined_call_operand.hbm [shape: f32[32,64], index: 3, kind: input, shape index: {}]   ;;  %s2566_s4 = inlined_call_operand.vmem [shape: f32[1,64], index: 4, kind: input, shape index: {}]   ;;  %s2567_s5 = inlined_call_operand.hbm [shape: f32[32,32], index: 5, kind: input, shape index: {}]   ;;  %s2568_s6 = inlined_call_operand.vmem [shape: f32[1,32], index: 6, kind: input, shape index: {}]   ;;  %s2569_s7 = inlined_call_operand.hbm [shape: f32[32,32], index: 7, kind: input, shape index: {}]   ;;  %s2570_s8 = inlined_call_operand.vmem [shape: f32[1,32], index: 8, kind: input, shape index: {}]   ;;  %s2571_s9 = inlined_call_operand.hbm [shape: f32[2,8,32], index: 9, kind: output, shape index: {}]  }
   0x1   :  { %15 = vsyncpa [#allocation6], 0 }
   0x2   :  { %16 = vsyncpa [#allocation9], 0 }
   0x3   :  { %17 = vsyncpa [#allocation12], 0 }
   0x4   :  { %18 = vsyncpa [#allocation4], 0  ;;  %s2202_s30 = smov [#allocation5]   ;;  %s2203_s11 = smov [#allocation8]  }
   0x5   :  { %s36_s10 = sshll.u32 %s2202_s30, 4  ;;  %s60_s12 = sshll.u32 %s2203_s11, 4  ;;  %s37_s10 = int_to_ptr.vmem [resolvable:$true] %s36_s10  ;;  %s2269_s12 = int_to_ptr.vmem [resolvable:$true] %s60_s12 }
   0x6   :  { %s2038_s15 = scalar_lea.hbm %s2563_s1, 256 }
   0x7   :  { %p2039_p0 = scmp.ne.s32.totalorder %s2563_s1, %s2038_s15  ;;  %p2042_p1 = scmp.lt.u32.totalorder %s2038_s15, %s2563_s1 }
   0x9   :  { %p2044_p2 = pnand %p2042_p1, %p2039_p0 }
   0xb   :  { %2047 = shalt.err (!%p2044_p2)
}
   0xc   :  { %s2048_s20 = scalar_lea.vmem %s37_s10, 256  ;;  %p2053_p4 = scmp.lt.s32.totalorder %s37_s10, %s37_s10 }
   0xd   :  { %p2049_p3 = scmp.ne.s32.totalorder %s37_s10, %s2048_s20  ;;  %p2054_p5 = scmp.lt.s32.totalorder %s2048_s20, %s2048_s20 }
   0xf   :  { %p2055_p6 = por %p2054_p5, %p2053_p4 }
  0x11   :  { %p2056_p7 = pnand %p2055_p6, %p2049_p3 }
  0x13   :  { %2059 = shalt.err (!%p2056_p7)
}
  0x14   :  { %s2204_s21 = smov 128   ;;  %s2205_s22 = smov 8  }
  0x15   :  { %42 = dma.hbm_to_vmem [thread:$0]  %s2563_s1, 256, %s37_s10, [#allocation6], %s2204_s21, %s2204_s21, %s2205_s22  }
  0x16   :  { %s2060_s27 = scalar_lea.hbm %s2565_s3, 512 }
  0x17   :  { %p2061_p8 = scmp.ne.s32.totalorder %s2565_s3, %s2060_s27  ;;  %p2064_p9 = scmp.lt.u32.totalorder %s2060_s27, %s2565_s3 }
  0x19   :  { %p2066_p10 = pnand %p2064_p9, %p2061_p8 }
  0x1b   :  { %2069 = shalt.err (!%p2066_p10)
}
  0x1c   :  { %s2070_s13 = scalar_lea.vmem %s2269_s12, 512  ;;  %p2075_p12 = scmp.lt.s32.totalorder %s2269_s12, %s2269_s12 }
  0x1d   :  { %p2071_p11 = scmp.ne.s32.totalorder %s2269_s12, %s2070_s13  ;;  %p2076_p13 = scmp.lt.s32.totalorder %s2070_s13, %s2070_s13 }
  0x1f   :  { %p2077_p0 = por %p2076_p13, %p2075_p12 }
  0x21   :  { %p2078_p1 = pnand %p2077_p0, %p2071_p11 }
  0x23   :  { %2081 = shalt.err (!%p2078_p1)
}
  0x24   :  { %66 = dma.hbm_to_vmem [thread:$0]  %s2565_s3, 512, %s2269_s12, [#allocation9], %s2204_s21, %s2204_s21, %s2205_s22  }
  0x25   :  { %s2206_s14 = smov [#allocation2]   ;;  %s2207_s16 = smov [#allocation7]  }
  0x26   :  { %s24_s15 = sshll.u32 %s2206_s14, 4  ;;  %s48_s17 = sshll.u32 %s2207_s16, 4  ;;  %s25_s15 = int_to_ptr.vmem [resolvable:$true] %s24_s15  ;;  %s2306_s17 = int_to_ptr.vmem [resolvable:$true] %s48_s17 }
  0x27   :  { %s2082_s20 = scalar_lea.hbm %s2562_s0, 256 }
  0x28   :  { %p2083_p2 = scmp.ne.s32.totalorder %s2562_s0, %s2082_s20  ;;  %p2086_p3 = scmp.lt.u32.totalorder %s2082_s20, %s2562_s0 }
  0x2a   :  { %p2088_p4 = pnand %p2086_p3, %p2083_p2 }
  0x2c   :  { %2091 = shalt.err (!%p2088_p4)
}
  0x2d   :  { %s2092_s3 = scalar_lea.vmem %s25_s15, 256  ;;  %p2097_p6 = scmp.lt.s32.totalorder %s25_s15, %s25_s15 }
  0x2e   :  { %p2093_p5 = scmp.ne.s32.totalorder %s25_s15, %s2092_s3  ;;  %p2098_p7 = scmp.lt.s32.totalorder %s2092_s3, %s2092_s3 }
  0x30   :  { %p2099_p8 = por %p2098_p7, %p2097_p6 }
  0x32   :  { %p2100_p9 = pnand %p2099_p8, %p2093_p5 }
  0x34   :  { %2103 = shalt.err (!%p2100_p9)
}
  0x35   :  { %30 = dma.hbm_to_vmem [thread:$0]  %s2562_s0, 256, %s25_s15, [#allocation3], %s2204_s21, %s2204_s21, %s2205_s22  }
  0x36   :  { %s2104_s30 = scalar_lea.hbm %s2564_s2, 256 }
  0x37   :  { %p2105_p10 = scmp.ne.s32.totalorder %s2564_s2, %s2104_s30  ;;  %p2108_p11 = scmp.lt.u32.totalorder %s2104_s30, %s2564_s2 }
  0x39   :  { %p2110_p12 = pnand %p2108_p11, %p2105_p10 }
  0x3b   :  { %2113 = shalt.err (!%p2110_p12)
}
  0x3c   :  { %s2114_s14 = scalar_lea.vmem %s2306_s17, 256  ;;  %p2119_p0 = scmp.lt.s32.totalorder %s2306_s17, %s2306_s17 }
  0x3d   :  { %p2115_p13 = scmp.ne.s32.totalorder %s2306_s17, %s2114_s14  ;;  %p2120_p1 = scmp.lt.s32.totalorder %s2114_s14, %s2114_s14 }
  0x3f   :  { %p2121_p2 = por %p2120_p1, %p2119_p0 }
  0x41   :  { %p2122_p3 = pnand %p2121_p2, %p2115_p13 }
  0x43   :  { %2125 = shalt.err (!%p2122_p3)
}
  0x44   :  { %54 = dma.hbm_to_vmem [thread:$0]  %s2564_s2, 256, %s2306_s17, [#allocation6], %s2204_s21, %s2204_s21, %s2205_s22  }
  0x45   :  { %s2208_s16 = smov [#allocation10]   ;;  %s2209_s19 = smov [#allocation11]  }
  0x46   :  { %s74_s18 = sshll.u32 %s2208_s16, 4  ;;  %s88_s20 = sshll.u32 %s2209_s19, 4  ;;  %s75_s18 = int_to_ptr.vmem [resolvable:$true] %s74_s18  ;;  %s2343_s20 = int_to_ptr.vmem [resolvable:$true] %s88_s20 }
  0x47   :  { %s2126_s25 = scalar_lea.hbm %s2567_s5, 512 }
  0x48   :  { %p2127_p4 = scmp.ne.s32.totalorder %s2567_s5, %s2126_s25  ;;  %p2130_p5 = scmp.lt.u32.totalorder %s2126_s25, %s2567_s5 }
  0x4a   :  { %p2132_p6 = pnand %p2130_p5, %p2127_p4 }
  0x4c   :  { %2135 = shalt.err (!%p2132_p6)
}
  0x4d   :  { %s2136_s2 = scalar_lea.vmem %s75_s18, 512  ;;  %p2141_p8 = scmp.lt.s32.totalorder %s75_s18, %s75_s18 }
  0x4e   :  { %p2137_p7 = scmp.ne.s32.totalorder %s75_s18, %s2136_s2  ;;  %p2142_p9 = scmp.lt.s32.totalorder %s2136_s2, %s2136_s2 }
  0x50   :  { %p2143_p10 = por %p2142_p9, %p2141_p8 }
  0x52   :  { %p2144_p11 = pnand %p2143_p10, %p2137_p7 }
  0x54   :  { %2147 = shalt.err (!%p2144_p11)
}
  0x55   :  { %80 = dma.hbm_to_vmem [thread:$0]  %s2567_s5, 512, %s75_s18, [#allocation9], %s2204_s21, %s2204_s21, %s2205_s22  }
  0x56   :  { %s2148_s11 = scalar_lea.hbm %s2569_s7, 512 }
  0x57   :  { %p2149_p12 = scmp.ne.s32.totalorder %s2569_s7, %s2148_s11  ;;  %p2152_p13 = scmp.lt.u32.totalorder %s2148_s11, %s2569_s7 }
  0x59   :  { %p2154_p0 = pnand %p2152_p13, %p2149_p12 }
  0x5b   :  { %2157 = shalt.err (!%p2154_p0)
}
  0x5c   :  { %s2158_s0 = scalar_lea.vmem %s2343_s20, 512  ;;  %p2163_p2 = scmp.lt.s32.totalorder %s2343_s20, %s2343_s20 }
  0x5d   :  { %p2159_p1 = scmp.ne.s32.totalorder %s2343_s20, %s2158_s0  ;;  %p2164_p3 = scmp.lt.s32.totalorder %s2158_s0, %s2158_s0 }
  0x5f   :  { %p2165_p4 = por %p2164_p3, %p2163_p2 }
  0x61   :  { %p2166_p5 = pnand %p2165_p4, %p2159_p1 }
  0x63   :  { %2169 = shalt.err (!%p2166_p5)
}
  0x64   :  { %94 = dma.hbm_to_vmem [thread:$0]  %s2569_s7, 512, %s2343_s20, [#allocation12], %s2204_s21, %s2204_s21, %s2205_s22  }
  0x65   :  { %2192 = dma.done.wait [#allocation3], 256  }
  0x66   :  { %2193 = vsyncadd [#allocation3], 4294967040 }
  0x67   :  { %2194 = dma.done.wait [#allocation6], 512  }
  0x68   :  { %2195 = vsyncadd [#allocation6], 4294966784 }
  0x69   :  { %2196 = dma.done.wait [#allocation9], 1024  }
  0x6a   :  { %2197 = vsyncadd [#allocation9], 4294966272 }
  0x6b   :  { %2198 = dma.done.wait [#allocation12], 512  }
  0x6c   :  { %2199 = vsyncadd [#allocation12], 4294966784  ;;  %v119_v0 = vld [vmem:[#allocation8] sm:$0xff]  ;;  %v120_v1 = vld [vmem:[#allocation8 + $0x8] sm:$0xff]  ;;  %vm130_vm0 = vcmask 261120   ;;  %v2210_v16 = vmov 0.0  }
  0x6d   :  { %v212_v2 = vld [vmem:[#allocation10] sm:$0xff]  ;;  %v1965_v3 = vpack.c.bf16 %v120_v1, %v119_v0  ;;  %v213_v4 = vld [vmem:[#allocation10 + $0x8] sm:$0xff]  ;;  %v121_v5 = vld [vmem:[#allocation8 + $0x10] sm:$0xff]  ;;  %vm2211_vm1 = vmmov 0   ;;  %vm334_vm2 = vcmask 64512   ;;  %s2212_s20 = smov 120  }
  0x6e   :  { %v122_v6 = vld [vmem:[#allocation8 + $0x18] sm:$0xff]  ;;  %v1973_v7 = vpack.c.bf16 %v213_v4, %v212_v2  ;;  %v214_v9 = vld [vmem:[#allocation10 + $0x10] sm:$0xff]  ;;  %v117_v13 = vld [vmem:[#allocation5] sm:$0xff]  ;;  %s2215_s23 = smov 96   ;;  %s2216_s24 = smov 16   ;;  %vm1649_vm3 = vcmask 130048  }
  0x6f   :  { %v1969_v8 = vpack.c.bf16 %v122_v6, %v121_v5  ;;  %v215_v10 = vld [vmem:[#allocation10 + $0x18] sm:$0xff]  ;;  %v115_v11 = vld [vmem:[#allocation2] sm:$0xff]  ;;  %1966 = vmatprep.subr.bf16.mxu0 %v1965_v3  ;;  %1871 = vmatprep.mubr.msk.f32.mxu1 %vm130_vm0, %v117_v13  ;;  %v118_v15 = vld [vmem:[#allocation5 + $0x8] sm:$0xff]  ;;  %s2217_s25 = smov 24   ;;  %vm1652_vm4 = vcmask 195584   ;;  %s2218_s12 = smov [#allocation13]  }
  0x70   :  { %v1977_v12 = vpack.c.bf16 %v215_v10, %v214_v9  ;;  %1860 = vmatprep.mubr.msk.f32.mxu0 %vm130_vm0, %v115_v11  ;;  %1974 = vmatprep.subr.bf16.mxu1 %v1973_v7  ;;  %v116_v14 = vld [vmem:[#allocation2 + $0x8] sm:$0xff]  ;;  %v1769_v17 = vld [vmem:[%s2566_s4] ss:$0 sm:$0xff]  ;;  %s2213_s4 = smov 112   ;;  %s1754_s27 = sshll.u32 %s2218_s12, 4  ;;  %s1755_s27 = int_to_ptr.vmem [resolvable:$true] %s1754_s27 }
  0x71   :  { %1968 = vmatpush3.bf16.msra.mxu0 %v1965_v3  ;;  %1976 = vmatpush3.bf16.msra.mxu1 %v1973_v7  ;;  %v1772_v18 = vld [vmem:[%s2568_s6] ss:$0 sm:$0xff]  ;;  %s2214_s6 = smov 104   ;;  %v333_v43 = vld [vmem:[#allocation7 + $0x8] sm:$0xff]  ;;  %s2170_s2 = scalar_lea.vmem %s1755_s27, 256 }
  0x72   :  { %1970 = vmatprep.subr.bf16.mxu0 %v1969_v8  ;;  %1978 = vmatprep.subr.bf16.mxu1 %v1977_v12  ;;  %v332_v39 = vld [vmem:[#allocation7] sm:$0xff]  ;;  %p2171_p6 = scmp.ne.s32.totalorder %s1755_s27, %s2170_s2  ;;  %p2175_p7 = scmp.lt.s32.totalorder %s1755_s27, %s1755_s27 }
  0x73   :  { %p2176_p8 = scmp.lt.s32.totalorder %s2170_s2, %s2170_s2 }
  0x75   :  { %1972 = vmatpush3.bf16.msra.mxu0 %v1969_v8  ;;  %1980 = vmatpush3.bf16.msra.mxu1 %v1977_v12  ;;  %p2177_p9 = por %p2176_p8, %p2175_p7 }
  0x76   :  { %1874 = vmatprep.subr.mxu1 %v2210_v16  ;;  %1884 = vmatprep.subr.mxu0 %v2210_v16 }
  0x77   :  { %p2178_p10 = pnand %p2177_p9, %p2171_p6 }
  0x78   :  { %1861 = vmatmul.mubr.msk.f32.vlgmr.msra.gmra.mrb[0].mxu0 %vm130_vm0, %v116_v14  ;;  %1872 = vmatmul.mubr.msk.f32.vlgmr.msra.gmra.mrb[0].mxu1 %vm130_vm0, %v118_v15 }
  0x79   :  { %1876 = vmatprep.mubr.msk.f32.mxu1 %vm2211_vm1, %v2210_v16  ;;  %1886 = vmatprep.mubr.msk.f32.mxu0 %vm2211_vm1, %v2210_v16 }
 0x14b   :  { %v1862_v19 = vpop.f32.mrb[0].mxu0  ;;  %v1873_v21 = vpop.f32.mrb[0].mxu1 }
 0x14c   :  { %v2396_v20 = vadd.f32 %v1862_v19, %v1769_v17  ;;  %v203_v22 = vpop.f32.mrb[1].mxu0  ;;  %v301_v23 = vadd.f32 %v1873_v21, %v1772_v18  ;;  %v295_v25 = vpop.f32.mrb[1].mxu1 }
 0x14d   :  { %v2398_v24 = vadd.f32 %v1769_v17, %v203_v22  ;;  %v296_v26 = vadd.f32 %v1772_v18, %v295_v25 }
 0x14e   :  { %322 = vrot.lane.b32.xlu0 %v2396_v20, %s2212_s20  ;;  %308 = vrot.lane.b32.xlu1 %v301_v23, %s2212_s20 }
 0x14f   :  { %1875 = vmatpush3.xpose.msk.msra.mxu1 %vm334_vm2, %v2398_v24 }
 0x150   :  { %1879 = vmatprep.subr.mxu1 %v2210_v16 }
 0x152   :  { %320 = vrot.lane.b32.xlu0 %v2398_v24, %s2212_s20  ;;  %1877 = vmatmul.mubr.msk.f32.vlgmr.msra.gmra.mrb[2].mxu1 %vm334_vm2, %v296_v26 }
 0x153   :  { %326 = vrot.lane.b32.xlu1 %v2396_v20, %s2213_s4  ;;  %1880 = vmatpush3.xpose.msk.msra.mxu1 %vm334_vm2, %v2396_v20 }
 0x154   :  { %1881 = vmatprep.mubr.msk.f32.mxu1 %vm2211_vm1, %v2210_v16  ;;  %1889 = vmatprep.subr.mxu1 %v2210_v16 }
 0x156   :  { %324 = vrot.lane.b32.xlu0 %v2398_v24, %s2213_s4  ;;  %1882 = vmatmul.mubr.msk.f32.vlgmr.msra.gmra.mrb[4].mxu1 %vm334_vm2, %v301_v23 }
 0x157   :  { %306 = vrot.lane.b32.xlu1 %v296_v26, %s2212_s20  ;;  %1891 = vmatprep.mubr.msk.f32.mxu1 %vm2211_vm1, %v2210_v16 }
 0x15a   :  { %310 = vrot.lane.b32.xlu0 %v296_v26, %s2213_s4 }
 0x15b   :  { %312 = vrot.lane.b32.xlu1 %v301_v23, %s2213_s4 }
 0x15e   :  { %328 = vrot.lane.b32.xlu0 %v2398_v24, %s2214_s6 }
 0x15f   :  { %330 = vrot.lane.b32.xlu1 %v2396_v20, %s2214_s6 }
 0x162   :  { %314 = vrot.lane.b32.xlu0 %v296_v26, %s2214_s6 }
 0x163   :  { %316 = vrot.lane.b32.xlu1 %v301_v23, %s2214_s6 }
 0x1c0   :  { %v2418_v27 = vpop.permute.xlu0 %322  ;;  %v309_v28 = vpop.permute.xlu1 %308 }
 0x1c1   :  { %1890 = vmatpush3.xpose.msk.msra.mxu1 %vm334_vm2, %v2418_v27 }
 0x1c2   :  { %1899 = vmatprep.subr.mxu1 %v2210_v16 }
 0x1c4   :  { %v2423_v29 = vpop.permute.xlu0 %320  ;;  %1892 = vmatmul.mubr.msk.f32.vlgmr.msra.gmra.mrb[6].mxu1 %vm334_vm2, %v309_v28 }
 0x1c5   :  { %v2426_v30 = vpop.permute.xlu1 %326  ;;  %1885 = vmatpush3.xpose.msk.msra.mxu0 %vm334_vm2, %v2423_v29  ;;  %1901 = vmatprep.mubr.msk.f32.mxu1 %vm2211_vm1, %v2210_v16 }
 0x1c6   :  { %1900 = vmatpush3.xpose.msk.msra.mxu1 %vm334_vm2, %v2426_v30  ;;  %1894 = vmatprep.subr.mxu0 %v2210_v16 }
 0x1c7   :  { %1909 = vmatprep.subr.mxu1 %v2210_v16 }
 0x1c8   :  { %v2436_v31 = vpop.permute.xlu0 %324 }
 0x1c9   :  { %v307_v32 = vpop.permute.xlu1 %306 }
 0x1ca   :  { %1887 = vmatmul.mubr.msk.f32.vlgmr.msra.gmra.mrb[2].mxu0 %vm334_vm2, %v307_v32 }
 0x1cb   :  { %1895 = vmatpush3.xpose.msk.msra.mxu0 %vm334_vm2, %v2436_v31  ;;  %1896 = vmatprep.mubr.msk.f32.mxu0 %vm2211_vm1, %v2210_v16 }
 0x1cc   :  { %v311_v33 = vpop.permute.xlu0 %310  ;;  %1904 = vmatprep.subr.mxu0 %v2210_v16 }
 0x1cd   :  { %v313_v34 = vpop.permute.xlu1 %312 }
 0x1ce   :  { %1897 = vmatmul.mubr.msk.f32.vlgmr.msra.gmra.mrb[4].mxu0 %vm334_vm2, %v311_v33  ;;  %1902 = vmatmul.mubr.msk.f32.vlgmr.msra.gmra.mrb[8].mxu1 %vm334_vm2, %v313_v34 }
 0x1cf   :  { %1906 = vmatprep.mubr.msk.f32.mxu0 %vm2211_vm1, %v2210_v16  ;;  %1911 = vmatprep.mubr.msk.f32.mxu1 %vm2211_vm1, %v2210_v16 }
 0x1d0   :  { %v2450_v35 = vpop.permute.xlu0 %328 }
 0x1d1   :  { %v2452_v36 = vpop.permute.xlu1 %330  ;;  %1905 = vmatpush3.xpose.msk.msra.mxu0 %vm334_vm2, %v2450_v35 }
 0x1d2   :  { %1910 = vmatpush3.xpose.msk.msra.mxu1 %vm334_vm2, %v2452_v36  ;;  %1914 = vmatprep.subr.mxu0 %v2210_v16 }
 0x1d3   :  { %1919 = vmatprep.subr.mxu1 %v2210_v16 }
 0x1d4   :  { %v315_v37 = vpop.permute.xlu0 %314 }
 0x1d5   :  { %v317_v38 = vpop.permute.xlu1 %316  ;;  %1907 = vmatmul.mubr.msk.f32.vlgmr.msra.gmra.mrb[6].mxu0 %vm334_vm2, %v315_v37 }
 0x1d6   :  { %1912 = vmatmul.mubr.msk.f32.vlgmr.msra.gmra.mrb[10].mxu1 %vm334_vm2, %v317_v38  ;;  %1916 = vmatprep.mubr.msk.f32.mxu0 %vm2211_vm1, %v2210_v16 }
 0x1d7   :  { %1921 = vmatprep.mubr.msk.f32.mxu1 %vm2211_vm1, %v2210_v16 }
 0x225   :  { %v405_v40 = vpop.f32.mrb[2].mxu1 }
 0x226   :  { %v406_v41 = vadd.f32 %v405_v40, %v332_v39  ;;  %v1878_v42 = vpop.f32.mrb[3].mxu1 }
 0x228   :  { %v927_v44 = vsel %vm334_vm2, %v406_v41, -inf }
 0x229   :  { %928 = vmax.xlane.f32.xlu0 %v927_v44  ;;  %v479_v45 = vpop.f32.mrb[4].mxu1 }
 0x22a   :  { %v480_v46 = vadd.f32 %v479_v45, %v333_v43  ;;  %v1883_v47 = vpop.f32.mrb[5].mxu1 }
 0x22c   :  { %v930_v48 = vsel %vm334_vm2, %v480_v46, -inf }
 0x22d   :  { %931 = vmax.xlane.f32.xlu1 %v930_v48 }
 0x297   :  { %v627_v49 = vpop.f32.mrb[6].mxu1 }
 0x298   :  { %v1893_v50 = vpop.f32.mrb[7].mxu1  ;;  %v628_v54 = vadd.f32 %v627_v49, %v333_v43 }
 0x29a   :  { %v936_v63 = vsel %vm334_vm2, %v628_v54, -inf }
 0x29d   :  { %v553_v51 = vpop.f32.mrb[2].mxu0 }
 0x29e   :  { %v554_v52 = vadd.f32 %v553_v51, %v332_v39  ;;  %v1888_v53 = vpop.f32.mrb[3].mxu0 }
 0x2a0   :  { %v933_v55 = vsel %vm334_vm2, %v554_v52, -inf }
 0x2a1   :  { %v701_v56 = vpop.f32.mrb[4].mxu0  ;;  %934 = vmax.xlane.f32.xlu0 %v933_v55  ;;  %v775_v57 = vpop.f32.mrb[8].mxu1 }
 0x2a2   :  { %v702_v58 = vadd.f32 %v701_v56, %v332_v39  ;;  %v1898_v59 = vpop.f32.mrb[5].mxu0  ;;  %v1903_v60 = vpop.f32.mrb[9].mxu1  ;;  %v776_v61 = vadd.f32 %v775_v57, %v333_v43 }
 0x2a4   :  { %v939_v62 = vsel %vm334_vm2, %v702_v58, -inf  ;;  %v942_v1 = vsel %vm334_vm2, %v776_v61, -inf }
 0x2a5   :  { %940 = vmax.xlane.f32.xlu1 %v939_v62  ;;  %937 = vmax.xlane.f32.xlu0 %v936_v63 }
 0x2a8   :  { %v849_v0 = vpop.f32.mrb[6].mxu0 }
 0x2a9   :  { %v850_v2 = vadd.f32 %v849_v0, %v332_v39  ;;  %943 = vmax.xlane.f32.xlu0 %v942_v1  ;;  %v923_v3 = vpop.f32.mrb[10].mxu1  ;;  %v1908_v4 = vpop.f32.mrb[7].mxu0 }
 0x2aa   :  { %v924_v5 = vadd.f32 %v923_v3, %v333_v43  ;;  %v1913_v6 = vpop.f32.mrb[11].mxu1 }
 0x2ab   :  { %v945_v7 = vsel %vm334_vm2, %v850_v2, -inf }
 0x2ac   :  { %946 = vmax.xlane.f32.xlu1 %v945_v7  ;;  %v948_v8 = vsel %vm334_vm2, %v924_v5, -inf }
 0x2ad   :  { %949 = vmax.xlane.f32.xlu0 %v948_v8 }
 0x2b6   :  { %v929_v11 = vpop.xlane.xlu0 %928 }
 0x2b7   :  { %v951_v13 = vsub.f32 %v406_v41, %v929_v11 }
 0x2b9   :  { %v959_v14 = vmul.f32 1.442695, %v951_v13 }
 0x2ba   :  { %v932_v9 = vpop.xlane.xlu1 %931 }
 0x2bb   :  { %v952_v10 = vsub.f32 %v480_v46, %v932_v9 }
 0x2bd   :  { %1015 = vrot.lane.b32.xlu1 %v2398_v24, %s2215_s23  ;;  %v961_v12 = vmul.f32 1.442695, %v952_v10 }
 0x2bf   :  { %2006 = vpow2.f32 %v961_v12 }
 0x2c0   :  { %2008 = vpow2.f32 %v959_v14 }
 0x2c1   :  { %1167 = vrot.lane.b32.xlu1 %v2423_v29, %s2215_s23 }
 0x2c3   :  { %1091 = vrot.lane.b32.xlu0 %v2396_v20, %s2215_s23 }
 0x2c5   :  { %1243 = vrot.lane.b32.xlu1 %v2418_v27, %s2215_s23 }
 0x2c7   :  { %1319 = vrot.lane.b32.xlu0 %v2436_v31, %s2215_s23 }
 0x2c9   :  { %1395 = vrot.lane.b32.xlu1 %v2426_v30, %s2215_s23  ;;  %v2486_v15 = vpop.eup %2006 }
 0x2ca   :  { %v978_v17 = vsel %vm334_vm2, %v2486_v15, 0.0  ;;  %v2490_v18 = vpop.eup %2008 }
 0x2cb   :  { %v975_v19 = vsel %vm334_vm2, %v2490_v18, 0.0 }
 0x2e6   :  { %979 = vadd.xlane.f32.xlu0 %v978_v17 }
 0x2ed   :  { %976 = vadd.xlane.f32.xlu1 %v975_v19 }
 0x32e   :  { %v935_v20 = vpop.xlane.xlu0 %934 }
 0x32f   :  { %v953_v21 = vsub.f32 %v554_v52, %v935_v20 }
 0x331   :  { %v963_v22 = vmul.f32 1.442695, %v953_v21 }
 0x332   :  { %v941_v23 = vpop.xlane.xlu1 %940  ;;  %v938_v24 = vpop.xlane.xlu0 %937 }
 0x333   :  { %2010 = vpow2.f32 %v963_v22  ;;  %v955_v25 = vsub.f32 %v702_v58, %v941_v23  ;;  %v954_v26 = vsub.f32 %v628_v54, %v938_v24  ;;  %v1655_v23 = vld [vmem:[#allocation11] sm:$0xff]  ;;  %v1656_v24 = vld [vmem:[#allocation11 + $0x8] sm:$0xff] }
 0x335   :  { %v967_v27 = vmul.f32 1.442695, %v955_v25  ;;  %v965_v28 = vmul.f32 1.442695, %v954_v26  ;;  %v1981_v25 = vpack.c.bf16 %v1656_v24, %v1655_v23  ;;  %v1657_v26 = vld [vmem:[#allocation11 + $0x10] sm:$0xff] }
 0x336   :  { %v944_v29 = vpop.xlane.xlu0 %943 }
 0x337   :  { %2012 = vpow2.f32 %v967_v27  ;;  %v956_v30 = vsub.f32 %v776_v61, %v944_v29  ;;  %v1658_v27 = vld [vmem:[#allocation11 + $0x18] sm:$0xff] }
 0x338   :  { %2014 = vpow2.f32 %v965_v28  ;;  %v1985_v28 = vpack.c.bf16 %v1658_v27, %v1657_v26 }
 0x339   :  { %v969_v31 = vmul.f32 1.442695, %v956_v30  ;;  %v947_v32 = vpop.xlane.xlu1 %946 }
 0x33a   :  { %v957_v33 = vsub.f32 %v850_v2, %v947_v32  ;;  %v950_v34 = vpop.xlane.xlu0 %949 }
 0x33b   :  { %2016 = vpow2.f32 %v969_v31  ;;  %v958_v37 = vsub.f32 %v924_v5, %v950_v34 }
 0x33c   :  { %v971_v38 = vmul.f32 1.442695, %v957_v33 }
 0x33d   :  { %v2011_v39 = vpop.eup %2010  ;;  %v973_v40 = vmul.f32 1.442695, %v958_v37  ;;  %v1016_v41 = vpop.permute.xlu1 %1015 }
 0x33e   :  { %2018 = vpow2.f32 %v971_v38  ;;  %v1092_v42 = vpop.permute.xlu0 %1091  ;;  %v981_v43 = vsel %vm334_vm2, %v2011_v39, 0.0  ;;  %1915 = vmatpush3.msra.mxu0 %v1016_v41 }
 0x33f   :  { %2020 = vpow2.f32 %v973_v40  ;;  %982 = vadd.xlane.f32.xlu1 %v981_v43  ;;  %1920 = vmatpush3.msra.mxu1 %v1092_v42 }
 0x340   :  { %1929 = vmatprep.subr.mxu1 %v2210_v16  ;;  %1924 = vmatprep.subr.mxu0 %v2210_v16 }
 0x341   :  { %v2013_v44 = vpop.eup %2012  ;;  %v1168_v54 = vpop.permute.xlu1 %1167 }
 0x342   :  { %v2015_v45 = vpop.eup %2014  ;;  %v987_v46 = vsel %vm334_vm2, %v2013_v44, 0.0  ;;  %v1320_v55 = vpop.permute.xlu0 %1319 }
 0x343   :  { %988 = vadd.xlane.f32.xlu1 %v987_v46  ;;  %v984_v47 = vsel %vm334_vm2, %v2015_v45, 0.0 }
 0x344   :  { %985 = vadd.xlane.f32.xlu0 %v984_v47 }
 0x345   :  { %v2017_v48 = vpop.eup %2016  ;;  %v1244_v56 = vpop.permute.xlu1 %1243 }
 0x346   :  { %v990_v49 = vsel %vm334_vm2, %v2017_v48, 0.0 }
 0x348   :  { %v2019_v50 = vpop.eup %2018  ;;  %991 = vadd.xlane.f32.xlu0 %v990_v49 }
 0x349   :  { %v2500_v51 = vpop.eup %2020  ;;  %v993_v52 = vsel %vm334_vm2, %v2019_v50, 0.0  ;;  %v1396_v58 = vpop.permute.xlu1 %1395 }
 0x34a   :  { %994 = vadd.xlane.f32.xlu1 %v993_v52  ;;  %v996_v53 = vsel %vm334_vm2, %v2500_v51, 0.0 }
 0x34c   :  { %997 = vadd.xlane.f32.xlu0 %v996_v53 }
 0x35b   :  { %1547 = vrot.lane.b32.xlu1 %v2452_v36, %s2215_s23 }
 0x362   :  { %1471 = vrot.lane.b32.xlu0 %v2450_v35, %s2215_s23 }
 0x373   :  { %v980_v57 = vpop.xlane.xlu0 %979 }
 0x374   :  { %2022 = vrcp.f32 %v980_v57 }
 0x37a   :  { %v977_v59 = vpop.xlane.xlu1 %976 }
 0x37b   :  { %2024 = vrcp.f32 %v977_v59 }
 0x37e   :  { %v2023_v60 = vpop.eup %2022 }
 0x37f   :  { %v1008_v61 = vmul.f32 %v2023_v60, %v2486_v15 }
 0x381   :  { %1922 = vmatmul.mubr.msk.f32.vlgmr.msra.gmra.mrb[12].mxu1 %vm334_vm2, %v1008_v61 }
 0x382   :  { %1930 = vmatpush3.msra.mxu1 %v1244_v56  ;;  %1931 = vmatprep.mubr.msk.f32.mxu1 %vm2211_vm1, %v2210_v16 }
 0x383   :  { %1939 = vmatprep.subr.mxu1 %v2210_v16 }
 0x385   :  { %v2025_v35 = vpop.eup %2024 }
 0x386   :  { %v1007_v36 = vmul.f32 %v2025_v35, %v2490_v18 }
 0x388   :  { %1917 = vmatmul.mubr.msk.f32.vlgmr.msra.gmra.mrb[8].mxu0 %vm334_vm2, %v1007_v36 }
 0x389   :  { %1925 = vmatpush3.msra.mxu0 %v1168_v54  ;;  %1926 = vmatprep.mubr.msk.f32.mxu0 %vm2211_vm1, %v2210_v16  ;;  %v1799_v54 = vld [vmem:[%s2570_s8] ss:$0 sm:$0xff] }
 0x38a   :  { %1934 = vmatprep.subr.mxu0 %v2210_v16 }
 0x3cc   :  { %v983_v62 = vpop.xlane.xlu1 %982 }
 0x3cd   :  { %2026 = vrcp.f32 %v983_v62 }
 0x3d0   :  { %v989_v63 = vpop.xlane.xlu1 %988 }
 0x3d1   :  { %2028 = vrcp.f32 %v989_v63  ;;  %v986_v0 = vpop.xlane.xlu0 %985 }
 0x3d2   :  { %2030 = vrcp.f32 %v986_v0 }
 0x3d5   :  { %v992_v1 = vpop.xlane.xlu0 %991 }
 0x3d6   :  { %2032 = vrcp.f32 %v992_v1 }
 0x3d7   :  { %v2027_v2 = vpop.eup %2026  ;;  %v995_v3 = vpop.xlane.xlu1 %994 }
 0x3d8   :  { %v1009_v4 = vmul.f32 %v2027_v2, %v2011_v39  ;;  %2034 = vrcp.f32 %v995_v3 }
 0x3d9   :  { %v998_v5 = vpop.xlane.xlu0 %997 }
 0x3da   :  { %2036 = vrcp.f32 %v998_v5  ;;  %1927 = vmatmul.mubr.msk.f32.vlgmr.msra.gmra.mrb[10].mxu0 %vm334_vm2, %v1009_v4 }
 0x3db   :  { %v2029_v6 = vpop.eup %2028  ;;  %1935 = vmatpush3.msra.mxu0 %v1320_v55  ;;  %1936 = vmatprep.mubr.msk.f32.mxu0 %vm2211_vm1, %v2210_v16  ;;  %v1548_v15 = vpop.permute.xlu1 %1547 }
 0x3dc   :  { %v2031_v7 = vpop.eup %2030  ;;  %v1011_v8 = vmul.f32 %v2029_v6, %v2013_v44  ;;  %1944 = vmatprep.subr.mxu0 %v2210_v16 }
 0x3dd   :  { %v1010_v9 = vmul.f32 %v2031_v7, %v2015_v45  ;;  %v1472_v10 = vpop.permute.xlu0 %1471 }
 0x3de   :  { %1937 = vmatmul.mubr.msk.f32.vlgmr.msra.gmra.mrb[12].mxu0 %vm334_vm2, %v1011_v8 }
 0x3df   :  { %1932 = vmatmul.mubr.msk.f32.vlgmr.msra.gmra.mrb[14].mxu1 %vm334_vm2, %v1010_v9  ;;  %1945 = vmatpush3.msra.mxu0 %v1472_v10 }
 0x3e0   :  { %v2033_v11 = vpop.eup %2032  ;;  %1940 = vmatpush3.msra.mxu1 %v1396_v58  ;;  %1941 = vmatprep.mubr.msk.f32.mxu1 %vm2211_vm1, %v2210_v16 }
 0x3e1   :  { %v1012_v12 = vmul.f32 %v2033_v11, %v2017_v48  ;;  %1949 = vmatprep.subr.mxu1 %v2210_v16  ;;  %1946 = vmatprep.mubr.msk.f32.mxu0 %vm2211_vm1, %v2210_v16 }
 0x3e2   :  { %v2035_v13 = vpop.eup %2034  ;;  %1982 = vmatprep.subr.bf16.mxu0 %v1981_v25 }
 0x3e3   :  { %v1013_v14 = vmul.f32 %v2035_v13, %v2019_v50  ;;  %1942 = vmatmul.mubr.msk.f32.vlgmr.msra.gmra.mrb[16].mxu1 %vm334_vm2, %v1012_v12 }
 0x3e4   :  { %v2037_v17 = vpop.eup %2036  ;;  %1950 = vmatpush3.msra.mxu1 %v1548_v15  ;;  %1951 = vmatprep.mubr.msk.f32.mxu1 %vm2211_vm1, %v2210_v16 }
 0x3e5   :  { %v1014_v18 = vmul.f32 %v2037_v17, %v2500_v51  ;;  %1947 = vmatmul.mubr.msk.f32.vlgmr.msra.gmra.mrb[14].mxu0 %vm334_vm2, %v1013_v14 }
 0x3e6   :  { %1984 = vmatpush3.bf16.msra.mxu0 %v1981_v25 }
 0x3e7   :  { %1952 = vmatmul.mubr.msk.f32.vlgmr.msra.gmra.mrb[18].mxu1 %vm334_vm2, %v1014_v18  ;;  %1986 = vmatprep.subr.bf16.mxu0 %v1985_v28 }
 0x3ea   :  { %1988 = vmatpush3.bf16.msra.mxu0 %v1985_v28 }
 0x454   :  { %v1163_v19 = vpop.f32.mrb[12].mxu1 }
 0x455   :  { %v1923_v20 = vpop.f32.mrb[13].mxu1 }
 0x45b   :  { %v1087_v21 = vpop.f32.mrb[8].mxu0 }
 0x45c   :  { %v1918_v22 = vpop.f32.mrb[9].mxu0 }
 0x4ad   :  { %v1239_v29 = vpop.f32.mrb[10].mxu0 }
 0x4ae   :  { %v1928_v16 = vpop.f32.mrb[11].mxu0  ;;  %1625 = vrot.lane.b32.xlu0 %v1239_v29, %s2205_s22 }
 0x4b1   :  { %v1391_v30 = vpop.f32.mrb[12].mxu0 }
 0x4b2   :  { %v1315_v31 = vpop.f32.mrb[14].mxu1  ;;  %1633 = vrot.lane.b32.xlu0 %v1391_v30, %s2216_s24  ;;  %v1938_v32 = vpop.f32.mrb[13].mxu0 }
 0x4b3   :  { %1627 = vrot.lane.b32.xlu1 %v1315_v31, %s2205_s22  ;;  %v1933_v33 = vpop.f32.mrb[15].mxu1 }
 0x4b6   :  { %v1467_v34 = vpop.f32.mrb[16].mxu1 }
 0x4b7   :  { %1635 = vrot.lane.b32.xlu1 %v1467_v34, %s2216_s24  ;;  %v1943_v37 = vpop.f32.mrb[17].mxu1 }
 0x4b8   :  { %v1543_v38 = vpop.f32.mrb[14].mxu0 }
 0x4b9   :  { %1641 = vrot.lane.b32.xlu0 %v1543_v38, %s2217_s25  ;;  %v1948_v39 = vpop.f32.mrb[15].mxu0 }
 0x4ba   :  { %v1619_v40 = vpop.f32.mrb[18].mxu1 }
 0x4bb   :  { %1643 = vrot.lane.b32.xlu1 %v1619_v40, %s2217_s25  ;;  %v1953_v41 = vpop.f32.mrb[19].mxu1 }
 0x520   :  { %v1626_v42 = vpop.permute.xlu0 %1625 }
 0x521   :  { %v1647_v46 = vsel %vm334_vm2, %v1087_v21, %v1626_v42 }
 0x524   :  { %v1634_v44 = vpop.permute.xlu0 %1633 }
 0x525   :  { %v1628_v43 = vpop.permute.xlu1 %1627  ;;  %v1650_v47 = vsel %vm1649_vm3, %v1647_v46, %v1634_v44 }
 0x526   :  { %v1648_v49 = vsel %vm334_vm2, %v1163_v19, %v1628_v43 }
 0x529   :  { %v1636_v45 = vpop.permute.xlu1 %1635 }
 0x52a   :  { %v1651_v51 = vsel %vm1649_vm3, %v1648_v49, %v1636_v45 }
 0x52b   :  { %v1642_v48 = vpop.permute.xlu0 %1641 }
 0x52c   :  { %v1653_v50 = vsel %vm1652_vm4, %v1650_v47, %v1642_v48 }
 0x52d   :  { %v1644_v52 = vpop.permute.xlu1 %1643  ;;  %1962 = vmatprep.mubr.msk.f32.mxu0 %vm130_vm0, %v1653_v50 }
 0x52e   :  { %v1654_v53 = vsel %vm1652_vm4, %v1651_v51, %v1644_v52 }
 0x52f   :  { %1963 = vmatmul.mubr.msk.f32.vlgmr.msra.gmra.mrb[16].mxu0 %vm130_vm0, %v1654_v53 }
 0x602   :  { %v1964_v55 = vpop.f32.mrb[16].mxu0 }
 0x603   :  { %v1744_v56 = vadd.f32 %v1964_v55, %v1799_v54  ;;  %v1738_v57 = vpop.f32.mrb[17].mxu0 }
 0x604   :  { %v1739_v58 = vadd.f32 %v1799_v54, %v1738_v57 }
 0x605   :  { %1748 = vst.msk [vmem:[#allocation13 + $0x8] sm:$0xff] %vm130_vm0, %v1744_v56 }
 0x606   :  { %1747 = vst.msk [vmem:[#allocation13] sm:$0xff] %vm130_vm0, %v1739_v58 }
 0x607   :  { %2181 = shalt.err (!%p2178_p10)
}
 0x608   :  { %s2182_s28 = scalar_lea.hbm %s2571_s9, 256 }
 0x609   :  { %p2183_p11 = scmp.ne.s32.totalorder %s2571_s9, %s2182_s28  ;;  %p2186_p12 = scmp.lt.u32.totalorder %s2182_s28, %s2571_s9 }
 0x60b   :  { %p2188_p13 = pnand %p2186_p12, %p2183_p11 }
 0x60d   :  { %2191 = shalt.err (!%p2188_p13)
}
 0x60e   :  { %1760 = dma.vmem_to_hbm [thread:$0]  %s1755_s27, 256, %s2571_s9, [#allocation4], %s2204_s21, %s2204_s21, %s2205_s22  }
 0x60f   :  { %2200 = dma.done.wait [#allocation4], 256  }
 0x610   :  { %2201 = vsyncadd [#allocation4], 4294967040 }
 0x611   :  { %1764 = vsyncpa [#allocation3], 1 }
 0x612   :  { %1765 = vsyncpa [#allocation6], 1 }
 0x613   :  { %1766 = vsyncpa [#allocation9], 1 }
 0x614   :  { %1767 = vsyncpa [#allocation12], 1 }
 0x615   :  { %1768 = vsyncpa [#allocation4], 1 }

</bundles_post_ra>
